<compile_context>
chip_gen: v7x
topology: tpu7x:2x2x1
jax: 0.10.0
libtpu: 0.0.40
codegen_flags: <defaults>
</compile_context>

<pallas_src>
import functools

import jax
import jax.numpy as jnp
from jax import lax
from jax.experimental import pallas as pl
from jax.experimental.pallas import tpu as pltpu

EPS = 1e-5

# Set True to fall back to the numerically-safer two-pass (centered) variance.
_USE_TWO_PASS_VAR = False


def _target_tile_bytes():
    """Per-stream f32 compute-tile target.

    ~2 MiB tiles reach ~85% of HBM roofline; 4 MiB adds ~1% on parts with
    128 MiB VMEM (v5e/v6e).  Keep 2 MiB on v7x (64 MiB VMEM) / unknown parts.
    """
    try:
        info = pltpu.get_tpu_info()
        vmem = getattr(info, "vmem_capacity_bytes", None)
        if vmem is not None and vmem >= (100 << 20):
            return 4 << 20
    except Exception:
        pass
    return 2 << 20


def _choose_block_b(B, N, E, target_tile_bytes):
    """Pick (Bb, grid_b) with grid_b = cdiv(B, Bb).

    - Tiny problem (everything fits one target tile): one grid step.
    - Otherwise: ~target-sized f32 tiles, aiming for >= ~4 grid steps when B
      permits so the DMA pipeline (and both v7x TensorCores) have work.
    """
    bytes_per_instance = N * E * 4  # f32 compute
    total_bytes = B * bytes_per_instance
    if total_bytes <= target_tile_bytes:
        return B, 1
    cap = max(1, target_tile_bytes // bytes_per_instance)
    cap = min(cap, max(1, B // 4))  # aim for >= ~4 grid steps
    Bb = max(1, min(cap, B))
    return Bb, pl.cdiv(B, Bb)


def _make_kernel(two_pass):
    def kernel(x1_ref, x2_ref, gamma_ref, beta_ref, o_ref):
        # x1_ref/x2_ref/o_ref: (Bb, N, E) ; gamma_ref/beta_ref: (1, 1, E)
        x = x1_ref[...].astype(jnp.float32) + x2_ref[...].astype(jnp.float32)
        inv_n = jnp.float32(1.0 / x.shape[1])

        if two_pass:
            mean = jnp.mean(x, axis=1, keepdims=True)                  # (Bb,1,E)
            centered = x - mean
            var = jnp.mean(centered * centered, axis=1, keepdims=True)
        else:
            # One-pass stats: no full-size centered temporary, one fewer
            # full-tile VMEM sweep.
            mean = jnp.sum(x, axis=1, keepdims=True) * inv_n           # (Bb,1,E)
            var = jnp.sum(x * x, axis=1, keepdims=True) * inv_n - mean * mean
            var = jnp.maximum(var, 0.0)  # guard cancellation-induced negatives

        inv_std = lax.rsqrt(var + EPS)                                  # (Bb,1,E)

        # Fold the per-channel affine into one scale/shift so the output pass
        # is a single fused mul+add over x.
        gamma = gamma_ref[...]                                          # (1,1,E)
        beta = beta_ref[...]                                            # (1,1,E)
        scale = inv_std * gamma                                         # (Bb,1,E)
        shift = beta - mean * scale                                     # (Bb,1,E)

        o_ref[...] = (x * scale + shift).astype(o_ref.dtype)

    return kernel


def add_and_instance_norm(input1, input2, weight, bias, *, target_tile_bytes=None):
    """input1, input2: (B, N, E); weight, bias: (E,). Returns (B, N, E)."""
    B, N, E = input1.shape
    if target_tile_bytes is None:
        target_tile_bytes = _target_tile_bytes()
    Bb, grid_b = _choose_block_b(B, N, E, target_tile_bytes)

    gamma = weight.reshape(1, 1, E)
    beta = bias.reshape(1, 1, E)

    io_itemsize = jnp.dtype(input1.dtype).itemsize
    tile_elems = Bb * N * E
    # 2 buffers x (2 inputs + 1 output) at I/O dtype, plus ~2 full-tile f32
    # temporaries, plus slack for Mosaic internal scratch.
    vmem_limit = 6 * tile_elems * io_itemsize + 2 * tile_elems * 4 + (4 << 20)
    vmem_limit = int(min(max(vmem_limit, 16 << 20), 48 << 20))

    cost = pl.CostEstimate(
        flops=8 * B * N * E,
        transcendentals=B * E,  # one rsqrt per (batch, channel)
        bytes_accessed=3 * B * N * E * io_itemsize
        + 2 * E * jnp.dtype(weight.dtype).itemsize,
    )

    # TODO(synk): if a single (1, N, E) instance ever exceeds the VMEM budget
    # (very large N*E), add a two-pass N-tiled variant (sum/sumsq accumulator
    # pass with the N axis marked "arbitrary", then a normalize pass).
    # TODO(synk): on v7x, evaluate pltpu.CORE_PARALLEL on the batch axis (and
    # >=2 steps per TensorCore) once verified to lower cleanly; plain
    # "parallel" is kept here for portability.

    return pl.pallas_call(
        _make_kernel(_USE_TWO_PASS_VAR),
        out_shape=jax.ShapeDtypeStruct((B, N, E), input1.dtype),
        grid_spec=pltpu.PrefetchScalarGridSpec(
            num_scalar_prefetch=0,
            grid=(grid_b,),
            in_specs=[
                pl.BlockSpec((Bb, N, E), lambda b: (b, 0, 0)),
                pl.BlockSpec((Bb, N, E), lambda b: (b, 0, 0)),
                pl.BlockSpec((1, 1, E), lambda b: (0, 0, 0)),
                pl.BlockSpec((1, 1, E), lambda b: (0, 0, 0)),
            ],
            out_specs=pl.BlockSpec((Bb, N, E), lambda b: (b, 0, 0)),
        ),
        compiler_params=pltpu.CompilerParams(
            dimension_semantics=("parallel",),
            vmem_limit_bytes=vmem_limit,
        ),
        cost_estimate=cost,
    )(input1, input2, gamma, beta)


def _reference(input1, input2, weight, bias):
    x = (input1 + input2).astype(jnp.float32)
    mean = jnp.mean(x, axis=1, keepdims=True)
    var = jnp.mean((x - mean) ** 2, axis=1, keepdims=True)
    y = (x - mean) / jnp.sqrt(var + EPS)
    return y * weight.reshape(1, 1, -1) + bias.reshape(1, 1, -1)


if __name__ == "__main__":
    key = jax.random.PRNGKey(0)
    k1, k2, k3, k4, k5, k6 = jax.random.split(key, 6)

    # CVRP-like small shapes: embedding_dim=128 (lane-dense), problem size 20.
    batch, problem, embedding_dim = 4, 20, 128

    input1 = jax.random.normal(k1, (batch, problem, embedding_dim), dtype=jnp.float32)
    input2 = jax.random.normal(k2, (batch, problem, embedding_dim), dtype=jnp.float32)
    # PyTorch default affine is ones/zeros; use non-trivial values to test it.
    weight = 1.0 + 0.1 * jax.random.normal(k3, (embedding_dim,), dtype=jnp.float32)
    bias = 0.1 * jax.random.normal(k4, (embedding_dim,), dtype=jnp.float32)

    out = add_and_instance_norm(input1, input2, weight, bias)
    jax.block_until_ready(out)
    ref = _reference(input1, input2, weight, bias)
    assert out.shape == (batch, problem, embedding_dim)
    assert jnp.allclose(out, ref, atol=1e-4, rtol=1e-4), "mismatch vs reference"

    # Second check: force the multi-step cdiv path with a ragged last batch
    # block (B=9, Bb=2 -> grid=5) to validate partial-block masking.
    b2 = 9
    a1 = jax.random.normal(k5, (b2, problem, embedding_dim), dtype=jnp.float32)
    a2 = jax.random.normal(k6, (b2, problem, embedding_dim), dtype=jnp.float32)
    out2 = add_and_instance_norm(a1, a2, weight, bias, target_tile_bytes=32 * 1024)
    jax.block_until_ready(out2)
    ref2 = _reference(a1, a2, weight, bias)
    assert out2.shape == (b2, problem, embedding_dim)
    assert jnp.allclose(out2, ref2, atol=1e-4, rtol=1e-4), "mismatch (ragged grid)"

    print("KERNEL_OK")
</pallas_src>

<mosaic_0001>
module attributes {stable_mosaic.version = 11 : i64} {
  func.func @kernel(%arg0: i32, %arg1: memref<4x20x128xf32, #tpu.memory_space<vmem>>, %arg2: memref<4x20x128xf32, #tpu.memory_space<vmem>>, %arg3: memref<1x1x128xf32, #tpu.memory_space<vmem>>, %arg4: memref<1x1x128xf32, #tpu.memory_space<vmem>>, %arg5: memref<4x20x128xf32, #tpu.memory_space<vmem>>) attributes {dimension_semantics = [#tpu.dimension_semantics<parallel>], iteration_bounds = array<i64: 1>, scalar_prefetch = 0 : i64, scratch_operands = 0 : i64, tpu.core_type = #tpu.core_type<tc>, window_params = [{transform_indices = @transform_0, window_bounds = array<i64: 4, 20, 128>}, {transform_indices = @transform_1, window_bounds = array<i64: 4, 20, 128>}, {pipeline_mode = #tpu.pipeline_mode<synchronous>, transform_indices = @transform_2, window_bounds = array<i64: 1, 1, 128>}, {pipeline_mode = #tpu.pipeline_mode<synchronous>, transform_indices = @transform_3, window_bounds = array<i64: 1, 1, 128>}, {transform_indices = @transform_4, window_bounds = array<i64: 4, 20, 128>}]} {
    %c0 = arith.constant 0 : index
    %c0_0 = arith.constant 0 : index
    %c0_1 = arith.constant 0 : index
    %0 = vector.load %arg1[%c0, %c0_0, %c0_1] : memref<4x20x128xf32, #tpu.memory_space<vmem>>, vector<4x20x128xf32>
    %c0_2 = arith.constant 0 : index
    %c0_3 = arith.constant 0 : index
    %c0_4 = arith.constant 0 : index
    %1 = vector.load %arg2[%c0_2, %c0_3, %c0_4] : memref<4x20x128xf32, #tpu.memory_space<vmem>>, vector<4x20x128xf32>
    %2 = arith.addf %0, %1 : vector<4x20x128xf32>
    %cst = arith.constant dense<0.000000e+00> : vector<4x128xf32>
    %3 = vector.multi_reduction <add>, %2, %cst [1] : vector<4x20x128xf32> to vector<4x128xf32>
    %4 = vector.shape_cast %3 : vector<4x128xf32> to vector<4x1x128xf32>
    %cst_5 = arith.constant 5.000000e-02 : f32
    %5 = vector.broadcast %cst_5 : f32 to vector<4x1x128xf32>
    %6 = arith.mulf %4, %5 : vector<4x1x128xf32>
    %7 = arith.mulf %2, %2 : vector<4x20x128xf32>
    %cst_6 = arith.constant dense<0.000000e+00> : vector<4x128xf32>
    %8 = vector.multi_reduction <add>, %7, %cst_6 [1] : vector<4x20x128xf32> to vector<4x128xf32>
    %9 = vector.shape_cast %8 : vector<4x128xf32> to vector<4x1x128xf32>
    %cst_7 = arith.constant 5.000000e-02 : f32
    %10 = vector.broadcast %cst_7 : f32 to vector<4x1x128xf32>
    %11 = arith.mulf %9, %10 : vector<4x1x128xf32>
    %12 = arith.mulf %6, %6 : vector<4x1x128xf32>
    %13 = arith.subf %11, %12 : vector<4x1x128xf32>
    %cst_8 = arith.constant 0.000000e+00 : f32
    %14 = vector.broadcast %cst_8 : f32 to vector<4x1x128xf32>
    %15 = arith.maximumf %13, %14 : vector<4x1x128xf32>
    %cst_9 = arith.constant 9.99999974E-6 : f32
    %16 = vector.broadcast %cst_9 : f32 to vector<4x1x128xf32>
    %17 = arith.addf %15, %16 : vector<4x1x128xf32>
    %18 = math.rsqrt %17 : vector<4x1x128xf32>
    %c0_10 = arith.constant 0 : index
    %c0_11 = arith.constant 0 : index
    %c0_12 = arith.constant 0 : index
    %19 = vector.load %arg3[%c0_10, %c0_11, %c0_12] : memref<1x1x128xf32, #tpu.memory_space<vmem>>, vector<1x1x128xf32>
    %c0_13 = arith.constant 0 : index
    %c0_14 = arith.constant 0 : index
    %c0_15 = arith.constant 0 : index
    %20 = vector.load %arg4[%c0_13, %c0_14, %c0_15] : memref<1x1x128xf32, #tpu.memory_space<vmem>>, vector<1x1x128xf32>
    %21 = vector.broadcast %19 : vector<1x1x128xf32> to vector<4x1x128xf32>
    %22 = arith.mulf %18, %21 : vector<4x1x128xf32>
    %23 = arith.mulf %6, %22 : vector<4x1x128xf32>
    %24 = vector.broadcast %20 : vector<1x1x128xf32> to vector<4x1x128xf32>
    %25 = arith.subf %24, %23 : vector<4x1x128xf32>
    %26 = vector.broadcast %22 : vector<4x1x128xf32> to vector<4x20x128xf32>
    %27 = arith.mulf %2, %26 : vector<4x20x128xf32>
    %28 = vector.broadcast %25 : vector<4x1x128xf32> to vector<4x20x128xf32>
    %29 = arith.addf %27, %28 : vector<4x20x128xf32>
    %c0_16 = arith.constant 0 : index
    %c0_17 = arith.constant 0 : index
    %c0_18 = arith.constant 0 : index
    %30 = vector.load %arg5[%c0_16, %c0_17, %c0_18] : memref<4x20x128xf32, #tpu.memory_space<vmem>>, vector<4x20x128xf32>
    tpu.vector_store %arg5[%c0_16, %c0_17, %c0_18], %29 {strides = array<i32>} : memref<4x20x128xf32, #tpu.memory_space<vmem>>, vector<4x20x128xf32>,
    return
  }
  func.func @transform_0(%arg0: i32) -> (i32, i32, i32) {
    %c0_i32 = arith.constant 0 : i32
    %c0_i32_0 = arith.constant 0 : i32
    %c0_i32_1 = arith.constant 0 : i32
    return %arg0, %c0_i32, %c0_i32_0 : i32, i32, i32
  }
  func.func @transform_1(%arg0: i32) -> (i32, i32, i32) {
    %c0_i32 = arith.constant 0 : i32
    %c0_i32_0 = arith.constant 0 : i32
    %c0_i32_1 = arith.constant 0 : i32
    return %arg0, %c0_i32, %c0_i32_0 : i32, i32, i32
  }
  func.func @transform_2(%arg0: i32) -> (i32, i32, i32) {
    %c0_i32 = arith.constant 0 : i32
    %c0_i32_0 = arith.constant 0 : i32
    %c0_i32_1 = arith.constant 0 : i32
    %c0_i32_2 = arith.constant 0 : i32
    return %c0_i32, %c0_i32_0, %c0_i32_1 : i32, i32, i32
  }
  func.func @transform_3(%arg0: i32) -> (i32, i32, i32) {
    %c0_i32 = arith.constant 0 : i32
    %c0_i32_0 = arith.constant 0 : i32
    %c0_i32_1 = arith.constant 0 : i32
    %c0_i32_2 = arith.constant 0 : i32
    return %c0_i32, %c0_i32_0, %c0_i32_1 : i32, i32, i32
  }
  func.func @transform_4(%arg0: i32) -> (i32, i32, i32) {
    %c0_i32 = arith.constant 0 : i32
    %c0_i32_0 = arith.constant 0 : i32
    %c0_i32_1 = arith.constant 0 : i32
    return %arg0, %c0_i32, %c0_i32_0 : i32, i32, i32
  }
}

</mosaic_0001>

<bundles_post_ra>
// kernel: tpu_custom_call.1
= control target key start
LH: loop header
LB: loop body
LE: loop exit
PB: predicated region body
PF: predicated region fallthrough
CT: control target
= control target key end

     0   :  { %vm54_vm0 = vcmask 1043456   ;;  %s517_s0 = inlined_call_operand.vmem [shape: f32[4,20,128], index: 0, kind: input, shape index: {}]   ;;  %s518_s1 = inlined_call_operand.vmem [shape: f32[4,20,128], index: 1, kind: input, shape index: {}]   ;;  %s519_s2 = inlined_call_operand.vmem [shape: f32[1,1,128], index: 2, kind: input, shape index: {}]   ;;  %s520_s3 = inlined_call_operand.vmem [shape: f32[1,1,128], index: 3, kind: input, shape index: {}]   ;;  %s521_s4 = inlined_call_operand.vmem [shape: f32[4,20,128], index: 4, kind: output, shape index: {}]  }
   0x1   :  { %v17_v0 = vld [vmem:[%s517_s0] sm:$0xff]  ;;  %v18_v1 = vld [vmem:[%s517_s0 + $0x8] sm:$0xff]  ;;  %v19_v2 = vld [vmem:[%s517_s0 + $0x10] sm:$0xf] }
   0x2   :  { %v29_v3 = vld [vmem:[%s518_s1] sm:$0xff]  ;;  %v30_v4 = vld [vmem:[%s518_s1 + $0x8] sm:$0xff]  ;;  %v31_v5 = vld [vmem:[%s518_s1 + $0x10] sm:$0xf] }
   0x3   :  { %v311_v6 = vadd.f32 %v29_v3, %v17_v0  ;;  %v313_v7 = vadd.f32 %v30_v4, %v18_v1  ;;  %v315_v8 = vadd.f32 %v31_v5, %v19_v2  ;;  %v20_v9 = vld [vmem:[%s517_s0 + $0x18] sm:$0xff]  ;;  %v21_v10 = vld [vmem:[%s517_s0 + $0x20] sm:$0xff]  ;;  %v22_v11 = vld [vmem:[%s517_s0 + $0x28] sm:$0xf] }
   0x4   :  { %v32_v12 = vld [vmem:[%s518_s1 + $0x18] sm:$0xff]  ;;  %v33_v17 = vld [vmem:[%s518_s1 + $0x20] sm:$0xff]  ;;  %v34_v18 = vld [vmem:[%s518_s1 + $0x28] sm:$0xf] }
   0x5   :  { %v53_v13 = vadd.f32 %v313_v7, %v311_v6  ;;  %v55_v14 = vsel %vm54_vm0, %v315_v8, 0.0  ;;  %v94_v15 = vmul.f32 %v311_v6, %v311_v6  ;;  %v95_v16 = vmul.f32 %v313_v7, %v313_v7  ;;  %v23_v19 = vld [vmem:[%s517_s0 + $0x30] sm:$0xff]  ;;  %v24_v24 = vld [vmem:[%s517_s0 + $0x38] sm:$0xff]  ;;  %v25_v28 = vld [vmem:[%s517_s0 + $0x40] sm:$0xf] }
   0x6   :  { %v96_v20 = vmul.f32 %v315_v8, %v315_v8  ;;  %v348_v21 = vadd.f32 %v32_v12, %v20_v9  ;;  %v350_v22 = vadd.f32 %v33_v17, %v21_v10  ;;  %v352_v23 = vadd.f32 %v34_v18, %v22_v11  ;;  %v35_v25 = vld [vmem:[%s518_s1 + $0x30] sm:$0xff]  ;;  %v36_v29 = vld [vmem:[%s518_s1 + $0x38] sm:$0xff]  ;;  %v37_v30 = vld [vmem:[%s518_s1 + $0x40] sm:$0xf] }
   0x7   :  { %v56_v26 = vadd.f32 %v55_v14, %v53_v13  ;;  %v106_v27 = vadd.f32 %v95_v16, %v94_v15  ;;  %v369_v31 = vadd.f32 %v35_v25, %v23_v19  ;;  %v382_v41 = vadd.f32 %v36_v29, %v24_v24  ;;  %v26_v48 = vld [vmem:[%s517_s0 + $0x48] sm:$0xff]  ;;  %v27_v58 = vld [vmem:[%s517_s0 + $0x50] sm:$0xff]  ;;  %v28_v63 = vld [vmem:[%s517_s0 + $0x58] sm:$0xf] }
   0x8   :  { %v107_v32 = vsel %vm54_vm0, %v96_v20, 0.0  ;;  %v63_v33 = vadd.f32 %v350_v22, %v348_v21  ;;  %v64_v34 = vsel %vm54_vm0, %v352_v23, 0.0  ;;  %v97_v35 = vmul.f32 %v348_v21, %v348_v21  ;;  %v38_v49 = vld [vmem:[%s518_s1 + $0x48] sm:$0xff]  ;;  %v39_v59 = vld [vmem:[%s518_s1 + $0x50] sm:$0xff]  ;;  %v40_v0 = vld [vmem:[%s518_s1 + $0x58] sm:$0xf] }
   0x9   :  { %v57_v36 = vrot.slane %v56_v26, 4  ;;  %v108_v37 = vadd.f32 %v107_v32, %v106_v27  ;;  %v98_v38 = vmul.f32 %v350_v22, %v350_v22  ;;  %v99_v39 = vmul.f32 %v352_v23, %v352_v23 }
   0xa   :  { %v65_v40 = vadd.f32 %v64_v34, %v63_v33  ;;  %v384_v42 = vadd.f32 %v37_v30, %v25_v28  ;;  %v100_v43 = vmul.f32 %v369_v31, %v369_v31  ;;  %v72_v51 = vadd.f32 %v382_v41, %v369_v31 }
   0xb   :  { %v58_v44 = vadd.f32 %v57_v36, %v56_v26  ;;  %v109_v45 = vrot.slane %v108_v37, 4  ;;  %v115_v46 = vadd.f32 %v98_v38, %v97_v35  ;;  %v116_v47 = vsel %vm54_vm0, %v99_v39, 0.0 }
   0xc   :  { %v66_v50 = vrot.slane %v65_v40, 4  ;;  %v73_v52 = vsel %vm54_vm0, %v384_v42, 0.0  ;;  %v101_v53 = vmul.f32 %v382_v41, %v382_v41  ;;  %v102_v57 = vmul.f32 %v384_v42, %v384_v42 }
   0xd   :  { %v59_v54 = vrot.slane %v58_v44, 2  ;;  %v110_v55 = vadd.f32 %v109_v45, %v108_v37  ;;  %v117_v56 = vadd.f32 %v116_v47, %v115_v46  ;;  %v74_v61 = vadd.f32 %v73_v52, %v72_v51 }
   0xe   :  { %v67_v60 = vadd.f32 %v66_v50, %v65_v40  ;;  %v124_v62 = vadd.f32 %v101_v53, %v100_v43  ;;  %v415_v1 = vadd.f32 %v38_v49, %v26_v48  ;;  %v125_v5 = vsel %vm54_vm0, %v102_v57, 0.0 }
   0xf   :  { %v60_v2 = vadd.f32 %v59_v54, %v58_v44  ;;  %v111_v3 = vrot.slane %v110_v55, 2  ;;  %v118_v4 = vrot.slane %v117_v56, 4  ;;  %v75_v10 = vrot.slane %v74_v61, 4 }
  0x10   :  { %v68_v9 = vrot.slane %v67_v60, 2  ;;  %v126_v11 = vadd.f32 %v125_v5, %v124_v62  ;;  %v418_v12 = vadd.f32 %v39_v59, %v27_v58  ;;  %v420_v16 = vadd.f32 %v40_v0, %v28_v63 }
  0x11   :  { %v61_v13 = vrot.slane %v60_v2, 1  ;;  %v112_v14 = vadd.f32 %v111_v3, %v110_v55  ;;  %v119_v15 = vadd.f32 %v118_v4, %v117_v56  ;;  %v76_v18 = vadd.f32 %v75_v10, %v74_v61 }
  0x12   :  { %v69_v17 = vadd.f32 %v68_v9, %v67_v60  ;;  %v127_v19 = vrot.slane %v126_v11, 4  ;;  %v81_v20 = vadd.f32 %v418_v12, %v415_v1  ;;  %v82_v27 = vsel %vm54_vm0, %v420_v16, 0.0 }
  0x13   :  { %v62_v24 = vadd.f32 %v61_v13, %v60_v2  ;;  %v113_v25 = vrot.slane %v112_v14, 1  ;;  %v120_v26 = vrot.slane %v119_v15, 2  ;;  %v77_v29 = vrot.slane %v76_v18, 2 }
  0x14   :  { %v70_v28 = vrot.slane %v69_v17, 1  ;;  %v128_v30 = vadd.f32 %v127_v19, %v126_v11  ;;  %v83_v32 = vadd.f32 %v82_v27, %v81_v20  ;;  %v103_v36 = vmul.f32 %v415_v1, %v415_v1 }
  0x15   :  { %v426_v33 = vmul.f32 0.05, %v62_v24  ;;  %v114_v34 = vadd.f32 %v113_v25, %v112_v14  ;;  %v121_v35 = vadd.f32 %v120_v26, %v119_v15  ;;  %v78_v38 = vadd.f32 %v77_v29, %v76_v18 }
  0x16   :  { %v71_v37 = vadd.f32 %v70_v28, %v69_v17  ;;  %v129_v39 = vrot.slane %v128_v30, 2  ;;  %v84_v40 = vrot.slane %v83_v32, 4  ;;  %v104_v46 = vmul.f32 %v418_v12, %v418_v12 }
  0x17   :  { %v142_v43 = vmul.f32 0.05, %v114_v34  ;;  %v146_v44 = vmul.f32 %v426_v33, %v426_v33  ;;  %v122_v45 = vrot.slane %v121_v35, 1  ;;  %v79_v48 = vrot.slane %v78_v38, 1 }
  0x18   :  { %v434_v47 = vmul.f32 0.05, %v71_v37  ;;  %v130_v49 = vadd.f32 %v129_v39, %v128_v30  ;;  %v85_v50 = vadd.f32 %v84_v40, %v83_v32  ;;  %v105_v53 = vmul.f32 %v420_v16, %v420_v16  ;;  %v166_v30 = vld [vmem:[%s519_s2] sm:$0x1] }
  0x19   :  { %v150_v51 = vsub.f32 %v142_v43, %v146_v44  ;;  %v123_v52 = vadd.f32 %v122_v45, %v121_v35  ;;  %v133_v54 = vadd.f32 %v104_v46, %v103_v36  ;;  %v80_v56 = vadd.f32 %v79_v48, %v78_v38  ;;  %v167_v39 = vld [vmem:[%s520_s3] sm:$0x1] }
  0x1a   :  { %v147_v55 = vmul.f32 %v434_v47, %v434_v47  ;;  %v131_v57 = vrot.slane %v130_v49, 1  ;;  %v86_v58 = vrot.slane %v85_v50, 2  ;;  %v134_v61 = vsel %vm54_vm0, %v105_v53, 0.0 }
  0x1b   :  { %v154_v59 = vmax.f32 %v150_v51, 0.0  ;;  %v143_v60 = vmul.f32 0.05, %v123_v52  ;;  %v441_v62 = vmul.f32 0.05, %v80_v56  ;;  %v135_v2 = vadd.f32 %v134_v61, %v133_v54 }
  0x1c   :  { %v132_v63 = vadd.f32 %v131_v57, %v130_v49  ;;  %v87_v0 = vadd.f32 %v86_v58, %v85_v50  ;;  %v180_v14 = vlaneseq }
  0x1d   :  { %v158_v3 = vadd.f32 1e-05, %v154_v59  ;;  %v151_v4 = vsub.f32 %v143_v60, %v147_v55  ;;  %v148_v9 = vmul.f32 %v441_v62, %v441_v62  ;;  %v136_v11 = vrot.slane %v135_v2, 4 }
  0x1e   :  { %v144_v5 = vmul.f32 0.05, %v132_v63  ;;  %v88_v10 = vrot.slane %v87_v0, 1  ;;  %v181_v25 = vshrl.u32 %v180_v14, 7 }
  0x1f   :  { %260 = vrsqrt.f32 %v158_v3  ;;  %v155_v13 = vmax.f32 %v151_v4, 0.0  ;;  %v137_v18 = vadd.f32 %v136_v11, %v135_v2 }
  0x20   :  { %v152_v15 = vsub.f32 %v144_v5, %v148_v9  ;;  %v89_v17 = vadd.f32 %v88_v10, %v87_v0  ;;  %v450_v32 = vsub.s32 0, %v181_v25 }
  0x21   :  { %v159_v19 = vadd.f32 1e-05, %v155_v13  ;;  %v138_v24 = vrot.slane %v137_v18, 2 }
  0x22   :  { %v156_v20 = vmax.f32 %v152_v15, 0.0  ;;  %v445_v27 = vmul.f32 0.05, %v89_v17 }
  0x23   :  { %262 = vrsqrt.f32 %v159_v19  ;;  %v139_v28 = vadd.f32 %v138_v24, %v137_v18 }
  0x24   :  { %v160_v26 = vadd.f32 1e-05, %v156_v20  ;;  %v149_v35 = vmul.f32 %v445_v27, %v445_v27 }
  0x25   :  { %v140_v29 = vrot.slane %v139_v28, 1 }
  0x26   :  { %264 = vrsqrt.f32 %v160_v26 }
  0x27   :  { %v141_v34 = vadd.f32 %v140_v29, %v139_v28 }
  0x29   :  { %v261_v36 = vpop.eup %260  ;;  %v145_v38 = vmul.f32 0.05, %v141_v34 }
  0x2a   :  { %v168_v37 = vmul.f32 %v261_v36, %v166_v30 }
  0x2b   :  { %v153_v44 = vsub.f32 %v145_v38, %v149_v35 }
  0x2c   :  { %v172_v40 = vmul.f32 %v168_v37, %v426_v33  ;;  %v183_v43 = vrot.slane %v168_v37, %v450_v32 }
  0x2d   :  { %v263_v45 = vpop.eup %262  ;;  %v157_v52 = vmax.f32 %v153_v44, 0.0 }
  0x2e   :  { %v176_v46 = vsub.f32 %v167_v39, %v172_v40  ;;  %v196_v48 = vmul.f32 %v183_v43, %v311_v6  ;;  %v197_v49 = vmul.f32 %v183_v43, %v313_v7  ;;  %v198_v50 = vmul.f32 %v183_v43, %v315_v8 }
  0x2f   :  { %v169_v51 = vmul.f32 %v263_v45, %v166_v30  ;;  %v161_v57 = vadd.f32 1e-05, %v157_v52 }
  0x30   :  { %v265_v53 = vpop.eup %264  ;;  %v215_v54 = vrot.slane %v176_v46, %v450_v32 }
  0x31   :  { %v173_v55 = vmul.f32 %v169_v51, %v434_v47  ;;  %v187_v33 = vrot.slane %v169_v51, %v450_v32  ;;  %v170_v56 = vmul.f32 %v265_v53, %v166_v30  ;;  %266 = vrsqrt.f32 %v161_v57 }
  0x32   :  { %v232_v58 = vadd.f32 %v215_v54, %v196_v48  ;;  %v233_v59 = vadd.f32 %v215_v54, %v197_v49  ;;  %v234_v60 = vadd.f32 %v215_v54, %v198_v50 }
  0x33   :  { %v177_v61 = vsub.f32 %v167_v39, %v173_v55  ;;  %v199_v6 = vmul.f32 %v187_v33, %v348_v21  ;;  %v200_v7 = vmul.f32 %v187_v33, %v350_v22  ;;  %v201_v8 = vmul.f32 %v187_v33, %v352_v23 }
  0x34   :  { %244 = vst [vmem:[%s521_s4] sm:$0xff] %v232_v58  ;;  %245 = vst [vmem:[%s521_s4 + $0x8] sm:$0xff] %v233_v59  ;;  %v174_v47 = vmul.f32 %v170_v56, %v441_v62  ;;  %v191_v21 = vrot.slane %v170_v56, %v450_v32 }
  0x35   :  { %246 = vst [vmem:[%s521_s4 + $0x10] sm:$0xf] %v234_v60  ;;  %v219_v22 = vrot.slane %v177_v61, %v450_v32 }
  0x36   :  { %v178_v23 = vsub.f32 %v167_v39, %v174_v47  ;;  %v202_v63 = vmul.f32 %v191_v21, %v369_v31  ;;  %v203_v0 = vmul.f32 %v191_v21, %v382_v41  ;;  %v204_v2 = vmul.f32 %v191_v21, %v384_v42 }
  0x37   :  { %v235_v3 = vadd.f32 %v219_v22, %v199_v6  ;;  %v236_v4 = vadd.f32 %v219_v22, %v200_v7  ;;  %v237_v5 = vadd.f32 %v219_v22, %v201_v8 }
  0x38   :  { %v223_v9 = vrot.slane %v178_v23, %v450_v32 }
  0x39   :  { %247 = vst [vmem:[%s521_s4 + $0x18] sm:$0xff] %v235_v3  ;;  %248 = vst [vmem:[%s521_s4 + $0x20] sm:$0xff] %v236_v4 }
  0x3a   :  { %249 = vst [vmem:[%s521_s4 + $0x28] sm:$0xf] %v237_v5  ;;  %v238_v31 = vadd.f32 %v223_v9, %v202_v63  ;;  %v239_v41 = vadd.f32 %v223_v9, %v203_v0  ;;  %v240_v42 = vadd.f32 %v223_v9, %v204_v2 }
  0x3b   :  { %v267_v62 = vpop.eup %266 }
  0x3c   :  { %250 = vst [vmem:[%s521_s4 + $0x30] sm:$0xff] %v238_v31  ;;  %251 = vst [vmem:[%s521_s4 + $0x38] sm:$0xff] %v239_v41  ;;  %v171_v10 = vmul.f32 %v267_v62, %v166_v30 }
  0x3d   :  { %252 = vst [vmem:[%s521_s4 + $0x40] sm:$0xf] %v240_v42 }
  0x3e   :  { %v175_v11 = vmul.f32 %v171_v10, %v445_v27  ;;  %v195_v13 = vrot.slane %v171_v10, %v450_v32 }
  0x40   :  { %v179_v14 = vsub.f32 %v167_v39, %v175_v11  ;;  %v205_v15 = vmul.f32 %v195_v13, %v415_v1  ;;  %v206_v17 = vmul.f32 %v195_v13, %v418_v12  ;;  %v207_v18 = vmul.f32 %v195_v13, %v420_v16 }
  0x42   :  { %v227_v19 = vrot.slane %v179_v14, %v450_v32 }
  0x44   :  { %v241_v20 = vadd.f32 %v227_v19, %v205_v15  ;;  %v242_v24 = vadd.f32 %v227_v19, %v206_v17  ;;  %v243_v25 = vadd.f32 %v227_v19, %v207_v18 }
  0x46   :  { %253 = vst [vmem:[%s521_s4 + $0x48] sm:$0xff] %v241_v20  ;;  %254 = vst [vmem:[%s521_s4 + $0x50] sm:$0xff] %v242_v24 }
  0x47   :  { %255 = vst [vmem:[%s521_s4 + $0x58] sm:$0xf] %v243_v25 }

</bundles_post_ra>
